<compile_context>
chip_gen: v7x
topology: tpu7x:2x2x1
jax: 0.10.0
libtpu: 0.0.40
codegen_flags: <defaults>
</compile_context>

<pallas_src>
import jax
import jax.numpy as jnp
from jax.experimental import pallas as pl
from jax.experimental.pallas import tpu as pltpu

HIDDEN_SIZE = 128
IN_FEATURES = 4
OUT_FEATURES = 2


def _policy_kernel(x_ref, w1_ref, b1_ref, w2d_ref, b2d_ref, out_ref):
    # x:   (TB, 4)       w1: (4, 128)      b1:  (1, 128)
    # w2d: (1, 128) = (w2[:,0]-w2[:,1]).T  b2d: (1,) in SMEM = b2[0]-b2[1]
    # out: (TB, 2)
    x = x_ref[...].astype(jnp.float32)
    w1 = w1_ref[...]

    # fc1 as 4 rank-1 VPU FMAs:  h = x @ w1 + b1   (no MXU; K=4 is MXU-hostile)
    h = b1_ref[...] + x[:, 0:1] * w1[0:1, :]
    h = h + x[:, 1:2] * w1[1:2, :]
    h = h + x[:, 2:3] * w1[2:3, :]
    h = h + x[:, 3:4] * w1[3:4, :]

    # dropout (eval-mode == identity) + ReLU
    h = jnp.maximum(h, 0.0)

    # fc2 + 2-class softmax == stable sigmoid of the logit difference:
    #   d = logit0 - logit1 = h @ (w2[:,0]-w2[:,1]) + (b2[0]-b2[1])
    d = jnp.sum(h * w2d_ref[...], axis=1, keepdims=True) + b2d_ref[0]  # (TB,1)
    ed = jnp.exp(-jnp.abs(d))          # EUP; in (0, 1], never overflows
    inv = 1.0 / (1.0 + ed)
    p_hi = inv                         # probability of the larger logit
    p_lo = ed * inv                    # probability of the smaller logit
    pos = d >= 0.0
    p0 = jnp.where(pos, p_hi, p_lo)
    p1 = jnp.where(pos, p_lo, p_hi)

    # Assemble the (TB, 2) output without a lane concatenate.
    col = jax.lax.broadcasted_iota(jnp.int32, out_ref.shape, 1)
    out_ref[...] = jnp.where(col == 0, p0, p1).astype(out_ref.dtype)


def policy_forward(state, w1, b1, w2, b2, *, block_b=256):
    """state: (B, 4) f32 -> action probabilities (B, 2) f32.

    Weights are stored as (in_features, out_features) -- transposed relative
    to torch's (out, in) -- so the math is y = x @ W + b.
    """
    B = state.shape[0]
    TB = B if B <= block_b else block_b            # full-dim block or 256-row tiles
    grid = (pl.cdiv(B, TB),)

    b1_2d = b1.reshape(1, HIDDEN_SIZE).astype(jnp.float32)
    w2_diff = (w2[:, 0] - w2[:, 1]).reshape(1, HIDDEN_SIZE).astype(jnp.float32)
    b2_diff = (b2[0] - b2[1]).reshape(1).astype(jnp.float32)

    return pl.pallas_call(
        _policy_kernel,
        out_shape=jax.ShapeDtypeStruct((B, OUT_FEATURES), jnp.float32),
        grid=grid,
        in_specs=[
            pl.BlockSpec((TB, IN_FEATURES), lambda i: (i, 0)),
            pl.BlockSpec((IN_FEATURES, HIDDEN_SIZE), lambda i: (0, 0)),  # resident
            pl.BlockSpec((1, HIDDEN_SIZE), lambda i: (0, 0)),            # resident
            pl.BlockSpec((1, HIDDEN_SIZE), lambda i: (0, 0)),            # resident
            pl.BlockSpec(memory_space=pltpu.MemorySpace.SMEM),           # scalar
        ],
        out_specs=pl.BlockSpec((TB, OUT_FEATURES), lambda i: (i, 0)),
        compiler_params=pltpu.CompilerParams(
            dimension_semantics=("parallel",)),
    )(state, w1, b1_2d, w2_diff, b2_diff)


def init_params(key):
    """Deterministic init mimicking PyTorch's default Linear init
    (uniform in +/- 1/sqrt(fan_in))."""
    k1, k2, k3, k4 = jax.random.split(key, 4)
    bound1 = 1.0 / jnp.sqrt(jnp.float32(IN_FEATURES))
    bound2 = 1.0 / jnp.sqrt(jnp.float32(HIDDEN_SIZE))
    w1 = jax.random.uniform(k1, (IN_FEATURES, HIDDEN_SIZE), jnp.float32,
                            -bound1, bound1)
    b1 = jax.random.uniform(k2, (HIDDEN_SIZE,), jnp.float32, -bound1, bound1)
    w2 = jax.random.uniform(k3, (HIDDEN_SIZE, OUT_FEATURES), jnp.float32,
                            -bound2, bound2)
    b2 = jax.random.uniform(k4, (OUT_FEATURES,), jnp.float32, -bound2, bound2)
    return w1, b1, w2, b2


def _reference(state, w1, b1, w2, b2):
    h = jnp.maximum(state @ w1 + b1, 0.0)
    logits = h @ w2 + b2
    return jax.nn.softmax(logits, axis=1)


if __name__ == "__main__":
    key = jax.random.PRNGKey(0)
    pkey, xkey, xkey2 = jax.random.split(key, 3)
    w1, b1, w2, b2 = init_params(pkey)

    # Small batch of CartPole states: (B, 4)
    B = 2
    state = jax.random.normal(xkey, (B, IN_FEATURES), jnp.float32)
    probs = jax.block_until_ready(policy_forward(state, w1, b1, w2, b2))
    ref = _reference(state, w1, b1, w2, b2)
    assert probs.shape == (B, OUT_FEATURES)
    assert jnp.allclose(probs, ref, atol=1e-5, rtol=1e-5)
    assert jnp.allclose(jnp.sum(probs, axis=1), 1.0, atol=1e-5)

    # Rollout-sized batch: exercises the tiled "parallel" grid over B.
    B2 = 512
    state2 = jax.random.normal(xkey2, (B2, IN_FEATURES), jnp.float32)
    probs2 = jax.block_until_ready(policy_forward(state2, w1, b1, w2, b2))
    ref2 = _reference(state2, w1, b1, w2, b2)
    assert probs2.shape == (B2, OUT_FEATURES)
    assert jnp.allclose(probs2, ref2, atol=1e-5, rtol=1e-5)
    assert jnp.allclose(jnp.sum(probs2, axis=1), 1.0, atol=1e-5)

    print("KERNEL_OK")
</pallas_src>

<mosaic_0001>
module attributes {stable_mosaic.version = 11 : i64} {
  func.func @_policy_kernel(%arg0: i32, %arg1: memref<2x4xf32, #tpu.memory_space<vmem>>, %arg2: memref<4x128xf32, #tpu.memory_space<vmem>>, %arg3: memref<1x128xf32, #tpu.memory_space<vmem>>, %arg4: memref<1x128xf32, #tpu.memory_space<vmem>>, %arg5: memref<1xf32, #tpu.memory_space<smem>>, %arg6: memref<2x2xf32, #tpu.memory_space<vmem>>) attributes {dimension_semantics = [#tpu.dimension_semantics<parallel>], iteration_bounds = array<i64: 1>, scalar_prefetch = 0 : i64, scratch_operands = 0 : i64, tpu.core_type = #tpu.core_type<tc>, window_params = [{transform_indices = @transform_0, window_bounds = array<i64: 2, 4>}, {pipeline_mode = #tpu.pipeline_mode<synchronous>, transform_indices = @transform_1, window_bounds = array<i64: 4, 128>}, {pipeline_mode = #tpu.pipeline_mode<synchronous>, transform_indices = @transform_2, window_bounds = array<i64: 1, 128>}, {pipeline_mode = #tpu.pipeline_mode<synchronous>, transform_indices = @transform_3, window_bounds = array<i64: 1, 128>}, {transform_indices = @transform_4, window_bounds = array<i64: 1>}, {transform_indices = @transform_5, window_bounds = array<i64: 2, 2>}]} {
    %c0 = arith.constant 0 : index
    %c0_0 = arith.constant 0 : index
    %0 = vector.load %arg1[%c0, %c0_0] : memref<2x4xf32, #tpu.memory_space<vmem>>, vector<2x4xf32>
    %c0_1 = arith.constant 0 : index
    %c0_2 = arith.constant 0 : index
    %1 = vector.load %arg2[%c0_1, %c0_2] : memref<4x128xf32, #tpu.memory_space<vmem>>, vector<4x128xf32>
    %c0_3 = arith.constant 0 : index
    %c0_4 = arith.constant 0 : index
    %2 = vector.load %arg3[%c0_3, %c0_4] : memref<1x128xf32, #tpu.memory_space<vmem>>, vector<1x128xf32>
    %3 = vector.extract_strided_slice %0 {offsets = [0, 0], sizes = [2, 1], strides = [1, 1]} : vector<2x4xf32> to vector<2x1xf32>
    %4 = vector.extract_strided_slice %1 {offsets = [0, 0], sizes = [1, 128], strides = [1, 1]} : vector<4x128xf32> to vector<1x128xf32>
    %5 = vector.broadcast %3 : vector<2x1xf32> to vector<2x128xf32>
    %6 = vector.broadcast %4 : vector<1x128xf32> to vector<2x128xf32>
    %7 = arith.mulf %5, %6 : vector<2x128xf32>
    %8 = vector.broadcast %2 : vector<1x128xf32> to vector<2x128xf32>
    %9 = arith.addf %8, %7 : vector<2x128xf32>
    %10 = vector.extract_strided_slice %0 {offsets = [0, 1], sizes = [2, 1], strides = [1, 1]} : vector<2x4xf32> to vector<2x1xf32>
    %11 = vector.extract_strided_slice %1 {offsets = [1, 0], sizes = [1, 128], strides = [1, 1]} : vector<4x128xf32> to vector<1x128xf32>
    %12 = vector.broadcast %10 : vector<2x1xf32> to vector<2x128xf32>
    %13 = vector.broadcast %11 : vector<1x128xf32> to vector<2x128xf32>
    %14 = arith.mulf %12, %13 : vector<2x128xf32>
    %15 = arith.addf %9, %14 : vector<2x128xf32>
    %16 = vector.extract_strided_slice %0 {offsets = [0, 2], sizes = [2, 1], strides = [1, 1]} : vector<2x4xf32> to vector<2x1xf32>
    %17 = vector.extract_strided_slice %1 {offsets = [2, 0], sizes = [1, 128], strides = [1, 1]} : vector<4x128xf32> to vector<1x128xf32>
    %18 = vector.broadcast %16 : vector<2x1xf32> to vector<2x128xf32>
    %19 = vector.broadcast %17 : vector<1x128xf32> to vector<2x128xf32>
    %20 = arith.mulf %18, %19 : vector<2x128xf32>
    %21 = arith.addf %15, %20 : vector<2x128xf32>
    %22 = vector.extract_strided_slice %0 {offsets = [0, 3], sizes = [2, 1], strides = [1, 1]} : vector<2x4xf32> to vector<2x1xf32>
    %23 = vector.extract_strided_slice %1 {offsets = [3, 0], sizes = [1, 128], strides = [1, 1]} : vector<4x128xf32> to vector<1x128xf32>
    %24 = vector.broadcast %22 : vector<2x1xf32> to vector<2x128xf32>
    %25 = vector.broadcast %23 : vector<1x128xf32> to vector<2x128xf32>
    %26 = arith.mulf %24, %25 : vector<2x128xf32>
    %27 = arith.addf %21, %26 : vector<2x128xf32>
    %cst = arith.constant 0.000000e+00 : f32
    %28 = vector.broadcast %cst : f32 to vector<2x128xf32>
    %29 = arith.maximumf %27, %28 : vector<2x128xf32>
    %c0_5 = arith.constant 0 : index
    %c0_6 = arith.constant 0 : index
    %30 = vector.load %arg4[%c0_5, %c0_6] : memref<1x128xf32, #tpu.memory_space<vmem>>, vector<1x128xf32>
    %31 = vector.broadcast %30 : vector<1x128xf32> to vector<2x128xf32>
    %32 = arith.mulf %29, %31 : vector<2x128xf32>
    %cst_7 = arith.constant dense<0.000000e+00> : vector<2xf32>
    %33 = vector.multi_reduction <add>, %32, %cst_7 [1] : vector<2x128xf32> to vector<2xf32>
    %34 = vector.shape_cast %33 : vector<2xf32> to vector<2x1xf32>
    %c0_8 = arith.constant 0 : index
    %35 = memref.load %arg5[%c0_8] : memref<1xf32, #tpu.memory_space<smem>>
    %36 = vector.broadcast %35 : f32 to vector<2x1xf32>
    %37 = arith.addf %34, %36 : vector<2x1xf32>
    %38 = math.absf %37 : vector<2x1xf32>
    %cst_9 = arith.constant 0.000000e+00 : f32
    %39 = vector.broadcast %cst_9 : f32 to vector<2x1xf32>
    %40 = arith.subf %39, %38 : vector<2x1xf32>
    %41 = math.exp %40 : vector<2x1xf32>
    %cst_10 = arith.constant 1.000000e+00 : f32
    %42 = vector.broadcast %cst_10 : f32 to vector<2x1xf32>
    %43 = arith.addf %42, %41 : vector<2x1xf32>
    %cst_11 = arith.constant 1.000000e+00 : f32
    %44 = vector.broadcast %cst_11 : f32 to vector<2x1xf32>
    %45 = arith.divf %44, %43 : vector<2x1xf32>
    %46 = arith.mulf %41, %45 : vector<2x1xf32>
    %cst_12 = arith.constant 0.000000e+00 : f32
    %47 = vector.broadcast %cst_12 : f32 to vector<2x1xf32>
    %48 = arith.cmpf oge, %37, %47 : vector<2x1xf32>
    %49 = arith.select %48, %45, %46 : vector<2x1xi1>, vector<2x1xf32>
    %50 = arith.select %48, %46, %45 : vector<2x1xi1>, vector<2x1xf32>
    %51 = tpu.iota {dimensions = array<i32: 1>} : vector<2x2xi32>
    %c0_i32 = arith.constant 0 : i32
    %52 = vector.broadcast %c0_i32 : i32 to vector<2x2xi32>
    %53 = arith.cmpi eq, %51, %52 : vector<2x2xi32>
    %54 = vector.shape_cast %49 : vector<2x1xf32> to vector<2x1xf32>
    %55 = vector.broadcast %54 : vector<2x1xf32> to vector<2x2xf32>
    %56 = vector.shape_cast %50 : vector<2x1xf32> to vector<2x1xf32>
    %57 = vector.broadcast %56 : vector<2x1xf32> to vector<2x2xf32>
    %58 = arith.select %53, %55, %57 : vector<2x2xi1>, vector<2x2xf32>
    %c0_13 = arith.constant 0 : index
    %c0_14 = arith.constant 0 : index
    %59 = vector.load %arg6[%c0_13, %c0_14] : memref<2x2xf32, #tpu.memory_space<vmem>>, vector<2x2xf32>
    tpu.vector_store %arg6[%c0_13, %c0_14], %58 {strides = array<i32>} : memref<2x2xf32, #tpu.memory_space<vmem>>, vector<2x2xf32>,
    return
  }
  func.func @transform_0(%arg0: i32) -> (i32, i32) {
    %c0_i32 = arith.constant 0 : i32
    %c0_i32_0 = arith.constant 0 : i32
    return %arg0, %c0_i32 : i32, i32
  }
  func.func @transform_1(%arg0: i32) -> (i32, i32) {
    %c0_i32 = arith.constant 0 : i32
    %c0_i32_0 = arith.constant 0 : i32
    %c0_i32_1 = arith.constant 0 : i32
    return %c0_i32, %c0_i32_0 : i32, i32
  }
  func.func @transform_2(%arg0: i32) -> (i32, i32) {
    %c0_i32 = arith.constant 0 : i32
    %c0_i32_0 = arith.constant 0 : i32
    %c0_i32_1 = arith.constant 0 : i32
    return %c0_i32, %c0_i32_0 : i32, i32
  }
  func.func @transform_3(%arg0: i32) -> (i32, i32) {
    %c0_i32 = arith.constant 0 : i32
    %c0_i32_0 = arith.constant 0 : i32
    %c0_i32_1 = arith.constant 0 : i32
    return %c0_i32, %c0_i32_0 : i32, i32
  }
  func.func @transform_4(%arg0: i32) -> i32 {
    %c0_i32 = arith.constant 0 : i32
    %c0_i32_0 = arith.constant 0 : i32
    return %c0_i32 : i32
  }
  func.func @transform_5(%arg0: i32) -> (i32, i32) {
    %c0_i32 = arith.constant 0 : i32
    %c0_i32_0 = arith.constant 0 : i32
    return %arg0, %c0_i32 : i32, i32
  }
}

</mosaic_0001>

<bundles_post_ra>
// kernel: tpu_custom_call.1
= control target key start
LH: loop header
LB: loop body
LE: loop exit
PB: predicated region body
PF: predicated region fallthrough
CT: control target
= control target key end

     0   :  { %v159_v1 = vmov 0   ;;  %v160_v2 = vmov 2   ;;  %s221_s0 = inlined_call_operand.vmem [shape: f32[2,4], index: 0, kind: input, shape index: {}]   ;;  %s222_s1 = inlined_call_operand.vmem [shape: f32[4,128], index: 1, kind: input, shape index: {}]   ;;  %s223_s2 = inlined_call_operand.vmem [shape: f32[1,128], index: 2, kind: input, shape index: {}]   ;;  %s224_s3 = inlined_call_operand.vmem [shape: f32[1,128], index: 3, kind: input, shape index: {}]   ;;  %s225_s4 = inlined_call_operand.<no memory space> [shape: f32[1], index: 4, kind: input, shape index: {}]   ;;  %s226_s5 = inlined_call_operand.hbm [shape: f32[2,2], index: 5, kind: output, shape index: {}]  }
   0x1   :  { %v22_v0 = vld [vmem:[%s221_s0] sm:$0x3]  ;;  %126 = vset.pattern.permute.xlu0 %v159_v1  ;;  %128 = vset.pattern.permute.xlu1 %v160_v2 }
   0x2   :  { %11 = vsyncpa [#allocation4], 0  ;;  %27 = vperm.xlu0 %126, %v22_v0   ;;  %53 = vperm.xlu1 %128, %v22_v0   ;;  %v161_v3 = vmov 1   ;;  %v162_v4 = vmov 3   ;;  %v30_v5 = vlaneseq  ;;  %v23_v8 = vld [vmem:[%s222_s1] sm:$0xf]  ;;  %v86_v33 = vstv %s225_s4 }
   0x3   :  { %v119_v17 = vld [vmem:[%s223_s2] ss:$0 sm:$0xff]  ;;  %vm81_vm0 = vcmask 1041408   ;;  %vm103_vm3 = vcmask 9216  }
   0x4   :  { %v31_v6 = vshrl.u32 %v30_v5, 7  ;;  %v120_v29 = vld [vmem:[%s224_s3] ss:$0 sm:$0xff]  ;;  %v100_v41 = vand.u32 127, %v30_v5  ;;  %s163_s3 = smov [#allocation3]  }
   0x5   :  { %s111_s25 = sshll.u32 %s163_s3, 4  ;;  %s112_s25 = int_to_ptr.vmem [resolvable:$true] %s111_s25 }
   0x6   :  { %127 = vset.pattern.permute.xlu0 %v161_v3  ;;  %129 = vset.pattern.permute.xlu1 %v162_v4  ;;  %v32_v7 = vsub.s32 0, %v31_v6  ;;  %v48_v10 = vsub.s32 1, %v31_v6  ;;  %v58_v12 = vsub.s32 2, %v31_v6  ;;  %v68_v14 = vsub.s32 3, %v31_v6  ;;  %s135_s4 = scalar_lea.vmem %s112_s25, 32  ;;  %p140_p1 = scmp.lt.s32.totalorder %s112_s25, %s112_s25 }
   0x7   :  { %43 = vperm.xlu0 %127, %v22_v0   ;;  %63 = vperm.xlu1 %129, %v22_v0   ;;  %vm101_vm1 = vcmp.eq.s32.totalorder %v100_v41, 0  ;;  %p136_p0 = scmp.ne.s32.totalorder %s112_s25, %s135_s4  ;;  %p141_p2 = scmp.lt.s32.totalorder %s135_s4, %s135_s4 }
   0x8   :  { %v33_v9 = vrot.slane %v23_v8, %v32_v7  ;;  %v49_v16 = vrot.slane %v23_v8, %v48_v10  ;;  %v59_v18 = vrot.slane %v23_v8, %v58_v12  ;;  %v69_v19 = vrot.slane %v23_v8, %v68_v14 }
   0x9   :  { %p142_p3 = por %p141_p2, %p140_p1 }
   0xb   :  { %130 = vset.pattern.permute.xlu0 %v162_v4  ;;  %p143_p4 = pnand %p142_p3, %p136_p0 }
  0x81   :  { %v28_v11 = vpop.permute.xlu0 %27  ;;  %v54_v13 = vpop.permute.xlu1 %53 }
  0x82   :  { %v34_v15 = vmul.f32 %v33_v9, %v28_v11  ;;  %v60_v24 = vmul.f32 %v59_v18, %v54_v13 }
  0x84   :  { %v41_v22 = vadd.f32 %v119_v17, %v34_v15 }
  0x86   :  { %v44_v20 = vpop.permute.xlu0 %43  ;;  %v64_v21 = vpop.permute.xlu1 %63 }
  0x87   :  { %v50_v23 = vmul.f32 %v49_v16, %v44_v20  ;;  %v70_v26 = vmul.f32 %v69_v19, %v64_v21 }
  0x89   :  { %v51_v25 = vadd.f32 %v50_v23, %v41_v22 }
  0x8b   :  { %v61_v27 = vadd.f32 %v60_v24, %v51_v25 }
  0x8d   :  { %v71_v28 = vadd.f32 %v70_v26, %v61_v27 }
  0x8f   :  { %v72_v30 = vmax.f32 %v71_v28, 0.0 }
  0x91   :  { %v80_v31 = vmul.f32 %v120_v29, %v72_v30 }
  0x93   :  { %v82_v32 = vsel %vm81_vm0, %v80_v31, 0.0 }
  0x94   :  { %83 = vadd.xlane.f32.xlu1 %v82_v32 }
 0x121   :  { %v84_v34 = vpop.xlane.xlu1 %83 }
 0x122   :  { %v87_v35 = vadd.f32 %v86_v33, %v84_v34 }
 0x124   :  { %v88_v36 = vand.u32 2147483647, %v87_v35  ;;  %vm96_vm2 = vcmp.ge.f32.partialorder %v87_v35, 0.0 }
 0x126   :  { %v89_v37 = vsub.f32 0.0, %v88_v36 }
 0x128   :  { %v90_v38 = vmul.f32 1.442695, %v89_v37 }
 0x12a   :  { %131 = vpow2.f32 %v90_v38 }
 0x134   :  { %v132_v39 = vpop.eup %131 }
 0x135   :  { %v92_v40 = vadd.f32 1.0, %v132_v39 }
 0x137   :  { %133 = vrcp.f32 %v92_v40 }
 0x141   :  { %v134_v42 = vpop.eup %133 }
 0x142   :  { %v95_v43 = vmul.f32 %v134_v42, %v132_v39 }
 0x144   :  { %v97_v44 = vsel %vm96_vm2, %v134_v42, %v95_v43  ;;  %v98_v45 = vsel %vm96_vm2, %v95_v43, %v134_v42 }
 0x145   :  { %v102_v46 = vsel %vm101_vm1, %v97_v44, %v98_v45 }
 0x146   :  { %104 = vst.msk [vmem:[#allocation3] sm:$0x3] %vm103_vm3, %v102_v46 }
 0x147   :  { %146 = shalt.err (!%p143_p4)
}
 0x148   :  { %s147_s28 = scalar_lea.hbm %s226_s5, 32 }
 0x149   :  { %p148_p5 = scmp.ne.s32.totalorder %s226_s5, %s147_s28  ;;  %p151_p6 = scmp.lt.u32.totalorder %s147_s28, %s226_s5 }
 0x14b   :  { %p153_p7 = pnand %p151_p6, %p148_p5 }
 0x14d   :  { %156 = shalt.err (!%p153_p7)
}
 0x14e   :  { %114 = dma.vmem_to_hbm [thread:$0]  %s112_s25, 32, %s226_s5, [#allocation4]  }
 0x14f   :  { %157 = dma.done.wait [#allocation4], 32  }
 0x150   :  { %158 = vsyncadd [#allocation4], 4294967264 }
 0x151   :  { %118 = vsyncpa [#allocation4], 1 }

</bundles_post_ra>
